<compile_context>
chip_gen: v5e
topology: v5e:2x2
jax: 0.10.0
libtpu: 0.0.40
codegen_flags: <defaults>
</compile_context>

<pallas_src>
import math
from functools import partial

import jax
import jax.numpy as jnp
from jax import lax
from jax.experimental import pallas as pl
from jax.experimental.pallas import tpu as pltpu

EPS = 1e-5


def _round_up8(c):
    return (c + 7) // 8 * 8


def _pad_axis(v, size, axis):
    pad = size - v.shape[axis]
    if pad == 0:
        return v
    widths = [(0, 0)] * v.ndim
    widths[axis] = (0, pad)
    return jnp.pad(v, widths)


def _boundary_masks(N, Ho, Wo):
    """(9, N) f32 validity masks for the 3x3 taps on the (b, y, x) -> lane
    flattening p = (b*Ho + y)*Wo + x.  Computed host-side (outside the kernel),
    so no vector int div/mod ever runs on the VPU."""
    pos = jnp.arange(N, dtype=jnp.int32)
    yy = (pos // Wo) % Ho
    xx = pos % Wo
    rows = []
    for dy in (-1, 0, 1):
        for dx in (-1, 0, 1):
            ok = jnp.ones((N,), dtype=bool)
            if dy == -1:
                ok = ok & (yy >= 1)
            if dy == 1:
                ok = ok & (yy <= Ho - 2)
            if dx == -1:
                ok = ok & (xx >= 1)
            if dx == 1:
                ok = ok & (xx <= Wo - 2)
            rows.append(ok)
    return jnp.stack(rows).astype(jnp.float32)


def down_kernel(xw_ref, m_ref, w1_ref, g1_ref, b1_ref, w2_ref, g2_ref, b2_ref,
                o_ref, *, offs, inv_n):
    # xw_ref : (4, Cin_p, N) f32   2x2 pool windows on the leading axis, N on lanes
    # m_ref  : (9, N)       f32    per-tap boundary masks (1.0 valid / 0.0 pad)
    # w*_ref : (C*_p, 9*C_p) f32   conv weights (tap-major, cin-minor), zero-padded
    # g*/b*  : (C*_p, 1)    f32    BN gamma / beta (zero for padded channels)
    # o_ref  : (Cout_p, N)  f32    lane-dense output
    N = o_ref.shape[-1]
    masks = m_ref[...]                                              # (9, N)

    def im2col(h):
        # h: (C_p, N) f32 -> (9*C_p, N); 8-row-aligned slabs, tap-major/cin-minor.
        pieces = []
        for t, off in enumerate(offs):
            if off == 0:
                pieces.append(h)                                    # center tap: always valid
            else:
                r = pltpu.roll(h, (-off) % N, axis=1)
                pieces.append(r * masks[t:t + 1, :])
        return jnp.concatenate(pieces, axis=0)

    def bn_relu(h, gamma, beta):
        # Training-mode BN (biased var) + ReLU; y = h*scale + shift (2 ops/elem).
        mean = jnp.sum(h, axis=1, keepdims=True) * inv_n            # (C, 1)
        ex2 = jnp.sum(h * h, axis=1, keepdims=True) * inv_n         # (C, 1)
        var = ex2 - mean * mean
        scale = gamma * lax.rsqrt(var + EPS)                        # (C, 1)
        shift = beta - mean * scale                                 # (C, 1)
        return jnp.maximum(h * scale + shift, 0.0)

    # ---- MaxPool2d(2): element-wise max over the 4 window slabs ----
    pooled = jnp.maximum(jnp.maximum(xw_ref[0], xw_ref[1]),
                         jnp.maximum(xw_ref[2], xw_ref[3]))         # (Cin_p, N)

    # ---- conv1 (single f32 MXU matmul) + BN + ReLU ----
    h1 = jnp.dot(w1_ref[...], im2col(pooled), preferred_element_type=jnp.float32)
    h1 = bn_relu(h1, g1_ref[...], b1_ref[...])                      # (Cmid_p, N)

    # ---- conv2 (single f32 MXU matmul) + BN + ReLU ----
    h2 = jnp.dot(w2_ref[...], im2col(h1), preferred_element_type=jnp.float32)
    o_ref[...] = bn_relu(h2, g2_ref[...], b2_ref[...]).astype(o_ref.dtype)


def _full_spec(shape):
    nd = len(shape)
    return pl.BlockSpec(shape, lambda i, _n=nd: (0,) * _n)


@jax.jit
def down_forward(x_nchw, w1, gb1, w2, gb2):
    """Down.forward.  Input/output are NCHW float32, like the PyTorch module.
    w1/w2 are HWIO (3,3,Cin,Cout) conv weights (no bias); gb* are (2, C) [gamma; beta]."""
    B, Cin, H, W = x_nchw.shape
    assert H % 2 == 0 and W % 2 == 0      # MaxPool2d(2) floor mode not handled
    Ho, Wo = H // 2, W // 2
    N = B * Ho * Wo
    assert N % 128 == 0                   # TODO(synk): lane-pad + mask BN sums for ragged N
    Cmid, Cout = w1.shape[-1], w2.shape[-1]
    Cin_p, Cmid_p, Cout_p = _round_up8(Cin), _round_up8(Cmid), _round_up8(Cout)

    # 2x2 pool windows as a leading axis of 4; (b, y, x) flattened onto lanes.
    # TODO(synk): fold this rearrange into the kernel via index_map at production sizes.
    xw = x_nchw.reshape(B, Cin, Ho, 2, Wo, 2)
    xw = xw.transpose(3, 5, 1, 0, 2, 4).reshape(4, Cin, N)
    xw = _pad_axis(xw, Cin_p, axis=1).astype(jnp.float32)           # (4, Cin_p, N)

    # Weights padded to 8-channel granules (zero rows/cols), then reshaped to
    # (Cout_p, 9*Cin_p) matrices (tap-major, cin-minor).  f32: MXU is idle here.
    w1p = jnp.pad(w1, ((0, 0), (0, 0), (0, Cin_p - Cin), (0, Cmid_p - Cmid)))
    w2p = jnp.pad(w2, ((0, 0), (0, 0), (0, Cmid_p - Cmid), (0, Cout_p - Cout)))
    w1m = jnp.transpose(w1p, (3, 0, 1, 2)).reshape(Cmid_p, 9 * Cin_p).astype(jnp.float32)
    w2m = jnp.transpose(w2p, (3, 0, 1, 2)).reshape(Cout_p, 9 * Cmid_p).astype(jnp.float32)

    g1 = _pad_axis(gb1[0], Cmid_p, 0).reshape(Cmid_p, 1).astype(jnp.float32)
    b1 = _pad_axis(gb1[1], Cmid_p, 0).reshape(Cmid_p, 1).astype(jnp.float32)
    g2 = _pad_axis(gb2[0], Cout_p, 0).reshape(Cout_p, 1).astype(jnp.float32)
    b2 = _pad_axis(gb2[1], Cout_p, 0).reshape(Cout_p, 1).astype(jnp.float32)

    masks = _boundary_masks(N, Ho, Wo)                              # (9, N) f32
    offs = tuple(dy * Wo + dx for dy in (-1, 0, 1) for dx in (-1, 0, 1))

    out = pl.pallas_call(
        partial(down_kernel, offs=offs, inv_n=1.0 / N),
        out_shape=jax.ShapeDtypeStruct((Cout_p, N), jnp.float32),
        grid=(1,),
        in_specs=[
            _full_spec((4, Cin_p, N)),
            _full_spec((9, N)),
            _full_spec((Cmid_p, 9 * Cin_p)),
            _full_spec((Cmid_p, 1)),
            _full_spec((Cmid_p, 1)),
            _full_spec((Cout_p, 9 * Cmid_p)),
            _full_spec((Cout_p, 1)),
            _full_spec((Cout_p, 1)),
        ],
        out_specs=_full_spec((Cout_p, N)),
        compiler_params=pltpu.CompilerParams(
            dimension_semantics=("arbitrary",),
            # Tiny working set here; at production tile sizes keep this <= ~32-48 MiB
            # on v7x (64 MiB physical) and raise it on v5e/v6e (128 MiB).
            vmem_limit_bytes=32 * 1024 * 1024,
        ),
    )(xw, masks, w1m, g1, b1, w2m, g2, b2)

    # (Cout_p, B*Ho*Wo) -> strip channel padding -> NCHW
    return out[:Cout].reshape(Cout, B, Ho, Wo).transpose(1, 0, 2, 3)


def reference_forward(x_nchw, w1, gb1, w2, gb2):
    """Pure-JAX reference of Down.forward (training-mode BN, f32 everywhere)."""
    x = jnp.transpose(x_nchw, (0, 2, 3, 1))
    p = lax.reduce_window(x, -jnp.inf, lax.max, (1, 2, 2, 1), (1, 2, 2, 1), "VALID")

    def conv(h, w):
        return lax.conv_general_dilated(
            h, w, (1, 1), "SAME",
            dimension_numbers=("NHWC", "HWIO", "NHWC"),
            precision=lax.Precision.HIGHEST)

    def bn_relu(h, gb):
        mean = jnp.mean(h, axis=(0, 1, 2), keepdims=True)
        var = jnp.mean((h - mean) ** 2, axis=(0, 1, 2), keepdims=True)
        y = (h - mean) * gb[0] * lax.rsqrt(var + EPS) + gb[1]
        return jnp.maximum(y, 0.0)

    h = bn_relu(conv(p, w1), gb1)
    h = bn_relu(conv(h, w2), gb2)
    return jnp.transpose(h, (0, 3, 1, 2))


if __name__ == "__main__":
    B, Cin, H, W = 2, 4, 16, 16
    Cout = 8
    Cmid = Cout  # DoubleConv default: mid_channels = out_channels

    key = jax.random.PRNGKey(0)
    kx, kw1, kw2 = jax.random.split(key, 3)

    x = jax.random.normal(kx, (B, Cin, H, W), jnp.float32)

    # Deterministic synthetic parameters (HWIO conv weights, no bias).
    w1 = jax.random.normal(kw1, (3, 3, Cin, Cmid), jnp.float32) / math.sqrt(9 * Cin)
    w2 = jax.random.normal(kw2, (3, 3, Cmid, Cout), jnp.float32) / math.sqrt(9 * Cmid)
    gb1 = jnp.stack([1.0 + 0.1 * jnp.arange(Cmid, dtype=jnp.float32),
                     0.05 * jnp.arange(Cmid, dtype=jnp.float32)])
    gb2 = jnp.stack([1.0 - 0.05 * jnp.arange(Cout, dtype=jnp.float32),
                     -0.02 * jnp.arange(Cout, dtype=jnp.float32)])

    out = jax.block_until_ready(down_forward(x, w1, gb1, w2, gb2))
    ref = jax.block_until_ready(reference_forward(x, w1, gb1, w2, gb2))

    assert out.shape == (B, Cout, H // 2, W // 2), out.shape
    assert out.dtype == jnp.float32
    # f32 MXU operands (bf16 dropped per perf review): tolerance covers f32
    # multi-pass rounding and reduction-order differences only.
    assert jnp.allclose(out, ref, atol=2e-3, rtol=2e-3), float(jnp.max(jnp.abs(out - ref)))

    print("KERNEL_OK")
</pallas_src>

<mosaic_0001>
module attributes {stable_mosaic.version = 11 : i64} {
  func.func @down_kernel(%arg0: i32, %arg1: memref<4x8x128xf32, #tpu.memory_space<vmem>>, %arg2: memref<9x128xf32, #tpu.memory_space<vmem>>, %arg3: memref<8x72xf32, #tpu.memory_space<vmem>>, %arg4: memref<8x1xf32, #tpu.memory_space<vmem>>, %arg5: memref<8x1xf32, #tpu.memory_space<vmem>>, %arg6: memref<8x72xf32, #tpu.memory_space<vmem>>, %arg7: memref<8x1xf32, #tpu.memory_space<vmem>>, %arg8: memref<8x1xf32, #tpu.memory_space<vmem>>, %arg9: memref<8x128xf32, #tpu.memory_space<vmem>>) attributes {dimension_semantics = [#tpu.dimension_semantics<arbitrary>], iteration_bounds = array<i64: 1>, scalar_prefetch = 0 : i64, scratch_operands = 0 : i64, tpu.core_type = #tpu.core_type<tc>, window_params = [{pipeline_mode = #tpu.pipeline_mode<synchronous>, transform_indices = @transform_0, window_bounds = array<i64: 4, 8, 128>}, {pipeline_mode = #tpu.pipeline_mode<synchronous>, transform_indices = @transform_1, window_bounds = array<i64: 9, 128>}, {pipeline_mode = #tpu.pipeline_mode<synchronous>, transform_indices = @transform_2, window_bounds = array<i64: 8, 72>}, {pipeline_mode = #tpu.pipeline_mode<synchronous>, transform_indices = @transform_3, window_bounds = array<i64: 8, 1>}, {pipeline_mode = #tpu.pipeline_mode<synchronous>, transform_indices = @transform_4, window_bounds = array<i64: 8, 1>}, {pipeline_mode = #tpu.pipeline_mode<synchronous>, transform_indices = @transform_5, window_bounds = array<i64: 8, 72>}, {pipeline_mode = #tpu.pipeline_mode<synchronous>, transform_indices = @transform_6, window_bounds = array<i64: 8, 1>}, {pipeline_mode = #tpu.pipeline_mode<synchronous>, transform_indices = @transform_7, window_bounds = array<i64: 8, 1>}, {pipeline_mode = #tpu.pipeline_mode<synchronous>, transform_indices = @transform_8, window_bounds = array<i64: 8, 128>}]} {
    %c0 = arith.constant 0 : index
    %c0_0 = arith.constant 0 : index
    %0 = vector.load %arg2[%c0, %c0_0] : memref<9x128xf32, #tpu.memory_space<vmem>>, vector<9x128xf32>
    %c0_1 = arith.constant 0 : index
    %c0_2 = arith.constant 0 : index
    %c0_3 = arith.constant 0 : index
    %1 = vector.load %arg1[%c0_1, %c0_2, %c0_3] : memref<4x8x128xf32, #tpu.memory_space<vmem>>, vector<1x8x128xf32>
    %2 = vector.shape_cast %1 : vector<1x8x128xf32> to vector<8x128xf32>
    %c1 = arith.constant 1 : index
    %c0_4 = arith.constant 0 : index
    %c0_5 = arith.constant 0 : index
    %3 = vector.load %arg1[%c1, %c0_4, %c0_5] : memref<4x8x128xf32, #tpu.memory_space<vmem>>, vector<1x8x128xf32>
    %4 = vector.shape_cast %3 : vector<1x8x128xf32> to vector<8x128xf32>
    %5 = arith.maximumf %2, %4 : vector<8x128xf32>
    %c2 = arith.constant 2 : index
    %c0_6 = arith.constant 0 : index
    %c0_7 = arith.constant 0 : index
    %6 = vector.load %arg1[%c2, %c0_6, %c0_7] : memref<4x8x128xf32, #tpu.memory_space<vmem>>, vector<1x8x128xf32>
    %7 = vector.shape_cast %6 : vector<1x8x128xf32> to vector<8x128xf32>
    %c3 = arith.constant 3 : index
    %c0_8 = arith.constant 0 : index
    %c0_9 = arith.constant 0 : index
    %8 = vector.load %arg1[%c3, %c0_8, %c0_9] : memref<4x8x128xf32, #tpu.memory_space<vmem>>, vector<1x8x128xf32>
    %9 = vector.shape_cast %8 : vector<1x8x128xf32> to vector<8x128xf32>
    %10 = arith.maximumf %7, %9 : vector<8x128xf32>
    %11 = arith.maximumf %5, %10 : vector<8x128xf32>
    %c0_10 = arith.constant 0 : index
    %c0_11 = arith.constant 0 : index
    %12 = vector.load %arg3[%c0_10, %c0_11] : memref<8x72xf32, #tpu.memory_space<vmem>>, vector<8x72xf32>
    %c9_i32 = arith.constant 9 : i32
    %13 = tpu.dynamic_rotate %11 by %c9_i32 dim 1 : vector<8x128xf32>, i32 -> vector<8x128xf32>
    %14 = vector.extract_strided_slice %0 {offsets = [0, 0], sizes = [1, 128], strides = [1, 1]} : vector<9x128xf32> to vector<1x128xf32>
    %15 = vector.broadcast %14 : vector<1x128xf32> to vector<8x128xf32>
    %16 = arith.mulf %13, %15 : vector<8x128xf32>
    %c8_i32 = arith.constant 8 : i32
    %17 = tpu.dynamic_rotate %11 by %c8_i32 dim 1 : vector<8x128xf32>, i32 -> vector<8x128xf32>
    %18 = vector.extract_strided_slice %0 {offsets = [1, 0], sizes = [1, 128], strides = [1, 1]} : vector<9x128xf32> to vector<1x128xf32>
    %19 = vector.broadcast %18 : vector<1x128xf32> to vector<8x128xf32>
    %20 = arith.mulf %17, %19 : vector<8x128xf32>
    %c7_i32 = arith.constant 7 : i32
    %21 = tpu.dynamic_rotate %11 by %c7_i32 dim 1 : vector<8x128xf32>, i32 -> vector<8x128xf32>
    %22 = vector.extract_strided_slice %0 {offsets = [2, 0], sizes = [1, 128], strides = [1, 1]} : vector<9x128xf32> to vector<1x128xf32>
    %23 = vector.broadcast %22 : vector<1x128xf32> to vector<8x128xf32>
    %24 = arith.mulf %21, %23 : vector<8x128xf32>
    %c1_i32 = arith.constant 1 : i32
    %25 = tpu.dynamic_rotate %11 by %c1_i32 dim 1 : vector<8x128xf32>, i32 -> vector<8x128xf32>
    %26 = vector.extract_strided_slice %0 {offsets = [3, 0], sizes = [1, 128], strides = [1, 1]} : vector<9x128xf32> to vector<1x128xf32>
    %27 = vector.broadcast %26 : vector<1x128xf32> to vector<8x128xf32>
    %28 = arith.mulf %25, %27 : vector<8x128xf32>
    %c127_i32 = arith.constant 127 : i32
    %29 = tpu.dynamic_rotate %11 by %c127_i32 dim 1 : vector<8x128xf32>, i32 -> vector<8x128xf32>
    %30 = vector.extract_strided_slice %0 {offsets = [5, 0], sizes = [1, 128], strides = [1, 1]} : vector<9x128xf32> to vector<1x128xf32>
    %31 = vector.broadcast %30 : vector<1x128xf32> to vector<8x128xf32>
    %32 = arith.mulf %29, %31 : vector<8x128xf32>
    %c121_i32 = arith.constant 121 : i32
    %33 = tpu.dynamic_rotate %11 by %c121_i32 dim 1 : vector<8x128xf32>, i32 -> vector<8x128xf32>
    %34 = vector.extract_strided_slice %0 {offsets = [6, 0], sizes = [1, 128], strides = [1, 1]} : vector<9x128xf32> to vector<1x128xf32>
    %35 = vector.broadcast %34 : vector<1x128xf32> to vector<8x128xf32>
    %36 = arith.mulf %33, %35 : vector<8x128xf32>
    %c120_i32 = arith.constant 120 : i32
    %37 = tpu.dynamic_rotate %11 by %c120_i32 dim 1 : vector<8x128xf32>, i32 -> vector<8x128xf32>
    %38 = vector.extract_strided_slice %0 {offsets = [7, 0], sizes = [1, 128], strides = [1, 1]} : vector<9x128xf32> to vector<1x128xf32>
    %39 = vector.broadcast %38 : vector<1x128xf32> to vector<8x128xf32>
    %40 = arith.mulf %37, %39 : vector<8x128xf32>
    %c119_i32 = arith.constant 119 : i32
    %41 = tpu.dynamic_rotate %11 by %c119_i32 dim 1 : vector<8x128xf32>, i32 -> vector<8x128xf32>
    %42 = vector.extract_strided_slice %0 {offsets = [8, 0], sizes = [1, 128], strides = [1, 1]} : vector<9x128xf32> to vector<1x128xf32>
    %43 = vector.broadcast %42 : vector<1x128xf32> to vector<8x128xf32>
    %44 = arith.mulf %41, %43 : vector<8x128xf32>
    %45 = tpu.concatenate %16, %20, %24, %28, %11, %32, %36, %40, %44 in 0 : vector<8x128xf32>, vector<8x128xf32>, vector<8x128xf32>, vector<8x128xf32>, vector<8x128xf32>, vector<8x128xf32>, vector<8x128xf32>, vector<8x128xf32>, vector<8x128xf32> -> vector<72x128xf32>
    %cst = arith.constant dense<0.000000e+00> : vector<8x128xf32>
    %46 = tpu.matmul %12, %45, %cst {dimension_numbers = #tpu.dot_dimension_numbers<[1], [0], [0], [1], [0, 0, 1, 1], [], []>} : vector<8x72xf32>, vector<72x128xf32>, vector<8x128xf32> -> vector<8x128xf32>
    %c0_12 = arith.constant 0 : index
    %c0_13 = arith.constant 0 : index
    %47 = vector.load %arg4[%c0_12, %c0_13] : memref<8x1xf32, #tpu.memory_space<vmem>>, vector<8x1xf32>
    %c0_14 = arith.constant 0 : index
    %c0_15 = arith.constant 0 : index
    %48 = vector.load %arg5[%c0_14, %c0_15] : memref<8x1xf32, #tpu.memory_space<vmem>>, vector<8x1xf32>
    %cst_16 = arith.constant dense<0.000000e+00> : vector<8xf32>
    %49 = vector.multi_reduction <add>, %46, %cst_16 [1] : vector<8x128xf32> to vector<8xf32>
    %50 = vector.shape_cast %49 : vector<8xf32> to vector<8x1xf32>
    %cst_17 = arith.constant 7.812500e-03 : f32
    %51 = vector.broadcast %cst_17 : f32 to vector<8x1xf32>
    %52 = arith.mulf %50, %51 : vector<8x1xf32>
    %53 = arith.mulf %46, %46 : vector<8x128xf32>
    %cst_18 = arith.constant dense<0.000000e+00> : vector<8xf32>
    %54 = vector.multi_reduction <add>, %53, %cst_18 [1] : vector<8x128xf32> to vector<8xf32>
    %55 = vector.shape_cast %54 : vector<8xf32> to vector<8x1xf32>
    %cst_19 = arith.constant 7.812500e-03 : f32
    %56 = vector.broadcast %cst_19 : f32 to vector<8x1xf32>
    %57 = arith.mulf %55, %56 : vector<8x1xf32>
    %58 = arith.mulf %52, %52 : vector<8x1xf32>
    %59 = arith.subf %57, %58 : vector<8x1xf32>
    %cst_20 = arith.constant 9.99999974E-6 : f32
    %60 = vector.broadcast %cst_20 : f32 to vector<8x1xf32>
    %61 = arith.addf %59, %60 : vector<8x1xf32>
    %62 = math.rsqrt %61 : vector<8x1xf32>
    %63 = arith.mulf %47, %62 : vector<8x1xf32>
    %64 = arith.mulf %52, %63 : vector<8x1xf32>
    %65 = arith.subf %48, %64 : vector<8x1xf32>
    %66 = vector.broadcast %63 : vector<8x1xf32> to vector<8x128xf32>
    %67 = arith.mulf %46, %66 : vector<8x128xf32>
    %68 = vector.broadcast %65 : vector<8x1xf32> to vector<8x128xf32>
    %69 = arith.addf %67, %68 : vector<8x128xf32>
    %cst_21 = arith.constant 0.000000e+00 : f32
    %70 = vector.broadcast %cst_21 : f32 to vector<8x128xf32>
    %71 = arith.maximumf %69, %70 : vector<8x128xf32>
    %c0_22 = arith.constant 0 : index
    %c0_23 = arith.constant 0 : index
    %72 = vector.load %arg6[%c0_22, %c0_23] : memref<8x72xf32, #tpu.memory_space<vmem>>, vector<8x72xf32>
    %c9_i32_24 = arith.constant 9 : i32
    %73 = tpu.dynamic_rotate %71 by %c9_i32_24 dim 1 : vector<8x128xf32>, i32 -> vector<8x128xf32>
    %74 = vector.extract_strided_slice %0 {offsets = [0, 0], sizes = [1, 128], strides = [1, 1]} : vector<9x128xf32> to vector<1x128xf32>
    %75 = vector.broadcast %74 : vector<1x128xf32> to vector<8x128xf32>
    %76 = arith.mulf %73, %75 : vector<8x128xf32>
    %c8_i32_25 = arith.constant 8 : i32
    %77 = tpu.dynamic_rotate %71 by %c8_i32_25 dim 1 : vector<8x128xf32>, i32 -> vector<8x128xf32>
    %78 = vector.extract_strided_slice %0 {offsets = [1, 0], sizes = [1, 128], strides = [1, 1]} : vector<9x128xf32> to vector<1x128xf32>
    %79 = vector.broadcast %78 : vector<1x128xf32> to vector<8x128xf32>
    %80 = arith.mulf %77, %79 : vector<8x128xf32>
    %c7_i32_26 = arith.constant 7 : i32
    %81 = tpu.dynamic_rotate %71 by %c7_i32_26 dim 1 : vector<8x128xf32>, i32 -> vector<8x128xf32>
    %82 = vector.extract_strided_slice %0 {offsets = [2, 0], sizes = [1, 128], strides = [1, 1]} : vector<9x128xf32> to vector<1x128xf32>
    %83 = vector.broadcast %82 : vector<1x128xf32> to vector<8x128xf32>
    %84 = arith.mulf %81, %83 : vector<8x128xf32>
    %c1_i32_27 = arith.constant 1 : i32
    %85 = tpu.dynamic_rotate %71 by %c1_i32_27 dim 1 : vector<8x128xf32>, i32 -> vector<8x128xf32>
    %86 = vector.extract_strided_slice %0 {offsets = [3, 0], sizes = [1, 128], strides = [1, 1]} : vector<9x128xf32> to vector<1x128xf32>
    %87 = vector.broadcast %86 : vector<1x128xf32> to vector<8x128xf32>
    %88 = arith.mulf %85, %87 : vector<8x128xf32>
    %c127_i32_28 = arith.constant 127 : i32
    %89 = tpu.dynamic_rotate %71 by %c127_i32_28 dim 1 : vector<8x128xf32>, i32 -> vector<8x128xf32>
    %90 = vector.extract_strided_slice %0 {offsets = [5, 0], sizes = [1, 128], strides = [1, 1]} : vector<9x128xf32> to vector<1x128xf32>
    %91 = vector.broadcast %90 : vector<1x128xf32> to vector<8x128xf32>
    %92 = arith.mulf %89, %91 : vector<8x128xf32>
    %c121_i32_29 = arith.constant 121 : i32
    %93 = tpu.dynamic_rotate %71 by %c121_i32_29 dim 1 : vector<8x128xf32>, i32 -> vector<8x128xf32>
    %94 = vector.extract_strided_slice %0 {offsets = [6, 0], sizes = [1, 128], strides = [1, 1]} : vector<9x128xf32> to vector<1x128xf32>
    %95 = vector.broadcast %94 : vector<1x128xf32> to vector<8x128xf32>
    %96 = arith.mulf %93, %95 : vector<8x128xf32>
    %c120_i32_30 = arith.constant 120 : i32
    %97 = tpu.dynamic_rotate %71 by %c120_i32_30 dim 1 : vector<8x128xf32>, i32 -> vector<8x128xf32>
    %98 = vector.extract_strided_slice %0 {offsets = [7, 0], sizes = [1, 128], strides = [1, 1]} : vector<9x128xf32> to vector<1x128xf32>
    %99 = vector.broadcast %98 : vector<1x128xf32> to vector<8x128xf32>
    %100 = arith.mulf %97, %99 : vector<8x128xf32>
    %c119_i32_31 = arith.constant 119 : i32
    %101 = tpu.dynamic_rotate %71 by %c119_i32_31 dim 1 : vector<8x128xf32>, i32 -> vector<8x128xf32>
    %102 = vector.extract_strided_slice %0 {offsets = [8, 0], sizes = [1, 128], strides = [1, 1]} : vector<9x128xf32> to vector<1x128xf32>
    %103 = vector.broadcast %102 : vector<1x128xf32> to vector<8x128xf32>
    %104 = arith.mulf %101, %103 : vector<8x128xf32>
    %105 = tpu.concatenate %76, %80, %84, %88, %71, %92, %96, %100, %104 in 0 : vector<8x128xf32>, vector<8x128xf32>, vector<8x128xf32>, vector<8x128xf32>, vector<8x128xf32>, vector<8x128xf32>, vector<8x128xf32>, vector<8x128xf32>, vector<8x128xf32> -> vector<72x128xf32>
    %cst_32 = arith.constant dense<0.000000e+00> : vector<8x128xf32>
    %106 = tpu.matmul %72, %105, %cst_32 {dimension_numbers = #tpu.dot_dimension_numbers<[1], [0], [0], [1], [0, 0, 1, 1], [], []>} : vector<8x72xf32>, vector<72x128xf32>, vector<8x128xf32> -> vector<8x128xf32>
    %c0_33 = arith.constant 0 : index
    %c0_34 = arith.constant 0 : index
    %107 = vector.load %arg7[%c0_33, %c0_34] : memref<8x1xf32, #tpu.memory_space<vmem>>, vector<8x1xf32>
    %c0_35 = arith.constant 0 : index
    %c0_36 = arith.constant 0 : index
    %108 = vector.load %arg8[%c0_35, %c0_36] : memref<8x1xf32, #tpu.memory_space<vmem>>, vector<8x1xf32>
    %cst_37 = arith.constant dense<0.000000e+00> : vector<8xf32>
    %109 = vector.multi_reduction <add>, %106, %cst_37 [1] : vector<8x128xf32> to vector<8xf32>
    %110 = vector.shape_cast %109 : vector<8xf32> to vector<8x1xf32>
    %cst_38 = arith.constant 7.812500e-03 : f32
    %111 = vector.broadcast %cst_38 : f32 to vector<8x1xf32>
    %112 = arith.mulf %110, %111 : vector<8x1xf32>
    %113 = arith.mulf %106, %106 : vector<8x128xf32>
    %cst_39 = arith.constant dense<0.000000e+00> : vector<8xf32>
    %114 = vector.multi_reduction <add>, %113, %cst_39 [1] : vector<8x128xf32> to vector<8xf32>
    %115 = vector.shape_cast %114 : vector<8xf32> to vector<8x1xf32>
    %cst_40 = arith.constant 7.812500e-03 : f32
    %116 = vector.broadcast %cst_40 : f32 to vector<8x1xf32>
    %117 = arith.mulf %115, %116 : vector<8x1xf32>
    %118 = arith.mulf %112, %112 : vector<8x1xf32>
    %119 = arith.subf %117, %118 : vector<8x1xf32>
    %cst_41 = arith.constant 9.99999974E-6 : f32
    %120 = vector.broadcast %cst_41 : f32 to vector<8x1xf32>
    %121 = arith.addf %119, %120 : vector<8x1xf32>
    %122 = math.rsqrt %121 : vector<8x1xf32>
    %123 = arith.mulf %107, %122 : vector<8x1xf32>
    %124 = arith.mulf %112, %123 : vector<8x1xf32>
    %125 = arith.subf %108, %124 : vector<8x1xf32>
    %126 = vector.broadcast %123 : vector<8x1xf32> to vector<8x128xf32>
    %127 = arith.mulf %106, %126 : vector<8x128xf32>
    %128 = vector.broadcast %125 : vector<8x1xf32> to vector<8x128xf32>
    %129 = arith.addf %127, %128 : vector<8x128xf32>
    %cst_42 = arith.constant 0.000000e+00 : f32
    %130 = vector.broadcast %cst_42 : f32 to vector<8x128xf32>
    %131 = arith.maximumf %129, %130 : vector<8x128xf32>
    %c0_43 = arith.constant 0 : index
    %c0_44 = arith.constant 0 : index
    %132 = vector.load %arg9[%c0_43, %c0_44] : memref<8x128xf32, #tpu.memory_space<vmem>>, vector<8x128xf32>
    tpu.vector_store %arg9[%c0_43, %c0_44], %131 {strides = array<i32>} : memref<8x128xf32, #tpu.memory_space<vmem>>, vector<8x128xf32>,
    return
  }
  func.func @transform_0(%arg0: i32) -> (i32, i32, i32) {
    %c0_i32 = arith.constant 0 : i32
    %c0_i32_0 = arith.constant 0 : i32
    %c0_i32_1 = arith.constant 0 : i32
    %c0_i32_2 = arith.constant 0 : i32
    return %c0_i32, %c0_i32_0, %c0_i32_1 : i32, i32, i32
  }
  func.func @transform_1(%arg0: i32) -> (i32, i32) {
    %c0_i32 = arith.constant 0 : i32
    %c0_i32_0 = arith.constant 0 : i32
    %c0_i32_1 = arith.constant 0 : i32
    return %c0_i32, %c0_i32_0 : i32, i32
  }
  func.func @transform_2(%arg0: i32) -> (i32, i32) {
    %c0_i32 = arith.constant 0 : i32
    %c0_i32_0 = arith.constant 0 : i32
    %c0_i32_1 = arith.constant 0 : i32
    return %c0_i32, %c0_i32_0 : i32, i32
  }
  func.func @transform_3(%arg0: i32) -> (i32, i32) {
    %c0_i32 = arith.constant 0 : i32
    %c0_i32_0 = arith.constant 0 : i32
    %c0_i32_1 = arith.constant 0 : i32
    return %c0_i32, %c0_i32_0 : i32, i32
  }
  func.func @transform_4(%arg0: i32) -> (i32, i32) {
    %c0_i32 = arith.constant 0 : i32
    %c0_i32_0 = arith.constant 0 : i32
    %c0_i32_1 = arith.constant 0 : i32
    return %c0_i32, %c0_i32_0 : i32, i32
  }
  func.func @transform_5(%arg0: i32) -> (i32, i32) {
    %c0_i32 = arith.constant 0 : i32
    %c0_i32_0 = arith.constant 0 : i32
    %c0_i32_1 = arith.constant 0 : i32
    return %c0_i32, %c0_i32_0 : i32, i32
  }
  func.func @transform_6(%arg0: i32) -> (i32, i32) {
    %c0_i32 = arith.constant 0 : i32
    %c0_i32_0 = arith.constant 0 : i32
    %c0_i32_1 = arith.constant 0 : i32
    return %c0_i32, %c0_i32_0 : i32, i32
  }
  func.func @transform_7(%arg0: i32) -> (i32, i32) {
    %c0_i32 = arith.constant 0 : i32
    %c0_i32_0 = arith.constant 0 : i32
    %c0_i32_1 = arith.constant 0 : i32
    return %c0_i32, %c0_i32_0 : i32, i32
  }
  func.func @transform_8(%arg0: i32) -> (i32, i32) {
    %c0_i32 = arith.constant 0 : i32
    %c0_i32_0 = arith.constant 0 : i32
    %c0_i32_1 = arith.constant 0 : i32
    return %c0_i32, %c0_i32_0 : i32, i32
  }
}

</mosaic_0001>

<bundles_post_ra>
// kernel: down_forward.1
= control target key start
LH: loop header
LB: loop body
LE: loop exit
PB: predicated region body
PF: predicated region fallthrough
CT: control target
= control target key end

     0   :  { %s248_s13 = smov 119   ;;  %s249_s14 = smov 121   ;;  %vm74_vm0 = vcmask 588800   ;;  %v256_v35 = vmov 0   ;;  %s400_s0 = inlined_call_operand.vmem [shape: f32[4,8,128], index: 0, kind: input, shape index: {}]   ;;  %s401_s1 = inlined_call_operand.vmem [shape: f32[9,128], index: 1, kind: input, shape index: {}]   ;;  %s402_s2 = inlined_call_operand.vmem [shape: f32[8,72], index: 2, kind: input, shape index: {}]   ;;  %s403_s3 = inlined_call_operand.vmem [shape: f32[8,1], index: 3, kind: input, shape index: {}]   ;;  %s404_s4 = inlined_call_operand.vmem [shape: f32[8,1], index: 4, kind: input, shape index: {}]   ;;  %s405_s5 = inlined_call_operand.vmem [shape: f32[8,72], index: 5, kind: input, shape index: {}]   ;;  %s406_s6 = inlined_call_operand.vmem [shape: f32[8,1], index: 6, kind: input, shape index: {}]   ;;  %s407_s7 = inlined_call_operand.vmem [shape: f32[8,1], index: 7, kind: input, shape index: {}]   ;;  %s408_s8 = inlined_call_operand.vmem [shape: f32[8,128], index: 8, kind: output, shape index: {}]  }
   0x1   :  { %v31_v0 = vld [vmem:[%s400_s0] sm:$0xff]  ;;  %v227_v1 = vld [vmem:[%s400_s0 + $0x8] sm:$0xff]  ;;  %v228_v2 = vld [vmem:[%s400_s0 + $0x10] sm:$0xff]  ;;  %s250_s15 = smov 1   ;;  %s251_s16 = smov 120   ;;  %241 = vset.pattern.permute.xlu1 %v256_v35  ;;  %242 = vset.pattern.permute.xlu0 %v256_v35 }
   0x2   :  { %v34_v3 = vmax.f32 %v31_v0, %v227_v1  ;;  %v229_v4 = vld [vmem:[%s400_s0 + $0x18] sm:$0xff]  ;;  %s252_s17 = smov 127   ;;  %s253_s18 = smov 7   ;;  %v325_v7 = vld [vmem:[%s401_s1 + $0x8] ss:$0 sm:$0xff]  ;;  %v331_v11 = vld [vmem:[%s401_s1] sm:$0xff] }
   0x3   :  { %v39_v5 = vmax.f32 %v228_v2, %v229_v4  ;;  %s254_s0 = smov 8   ;;  %s255_s19 = smov 9   ;;  %v68_v13 = vperm.slane %v331_v11, 7  ;;  %v64_v14 = vperm.slane %v331_v11, 6  ;;  %v60_v15 = vperm.slane %v331_v11, 5  ;;  %v41_v32 = vld [vmem:[%s402_s2] sm:$0xff] }
   0x4   :  { %v56_v21 = vperm.slane %v331_v11, 3  ;;  %v52_v22 = vperm.slane %v331_v11, 2  ;;  %v48_v24 = vperm.slane %v331_v11, 1  ;;  %v44_v28 = vperm.slane %v331_v11, 0  ;;  %v98_v48 = vld [vmem:[%s403_s3] sm:$0xff] }
   0x5   :  { %v40_v6 = vmax.f32 %v34_v3, %v39_v5  ;;  %v99_v53 = vld [vmem:[%s404_s4] sm:$0xff] }
   0x7   :  { %70 = vrot.lane.b32.xlu0 %v40_v6, %s248_s13  ;;  %62 = vrot.lane.b32.xlu1 %v40_v6, %s249_s14 }
   0x8   :  { %54 = vrot.lane.b32.xlu2 %v40_v6, %s250_s15 }
   0xf   :  { %66 = vrot.lane.b32.xlu0 %v40_v6, %s251_s16  ;;  %58 = vrot.lane.b32.xlu1 %v40_v6, %s252_s17 }
  0x10   :  { %50 = vrot.lane.b32.xlu2 %v40_v6, %s253_s18 }
  0x17   :  { %46 = vrot.lane.b32.xlu0 %v40_v6, %s254_s0  ;;  %42 = vrot.lane.b32.xlu1 %v40_v6, %s255_s19 }
  0x62   :  { %v55_v12 = vpop.permute.xlu2 %54 }
  0x63   :  { %v57_v26 = vmul.f32 %v56_v21, %v55_v12 }
  0x6a   :  { %v51_v23 = vpop.permute.xlu2 %50 }
  0x6b   :  { %v53_v27 = vmul.f32 %v52_v22, %v51_v23 }
  0x79   :  { %v71_v8 = vpop.permute.xlu0 %70  ;;  %v63_v9 = vpop.permute.xlu1 %62 }
  0x7a   :  { %v73_v10 = vmul.f32 %v325_v7, %v71_v8  ;;  %v65_v19 = vmul.f32 %v64_v14, %v63_v9 }
  0x7c   :  { %85 = vmatpush.msra.mxu0 %v73_v10 }
  0x81   :  { %v67_v16 = vpop.permute.xlu0 %66  ;;  %v59_v17 = vpop.permute.xlu1 %58 }
  0x82   :  { %v69_v18 = vmul.f32 %v68_v13, %v67_v16  ;;  %v61_v20 = vmul.f32 %v60_v15, %v59_v17 }
  0x84   :  { %86 = vmatpush.msra.mxu0 %v69_v18 }
  0x86   :  { %87 = vmatpush.msra.mxu0 %v65_v19 }
  0x88   :  { %88 = vmatpush.msra.mxu0 %v61_v20 }
  0x89   :  { %v47_v25 = vpop.permute.xlu0 %46  ;;  %v43_v29 = vpop.permute.xlu1 %42 }
  0x8a   :  { %89 = vmatpush.msra.mxu0 %v40_v6  ;;  %v49_v30 = vmul.f32 %v48_v24, %v47_v25  ;;  %v45_v31 = vmul.f32 %v44_v28, %v43_v29 }
  0x8c   :  { %90 = vmatpush.msra.mxu0 %v57_v26 }
  0x8e   :  { %91 = vmatpush.msra.mxu0 %v53_v27  ;;  %v184_v27 = vld [vmem:[%s406_s6] sm:$0xff] }
  0x90   :  { %92 = vmatpush.msra.mxu0 %v49_v30 }
  0x92   :  { %93 = vmatpush.msra.mxu0 %v45_v31 }
  0x93   :  { %230 = vmatmul.msk.f32.vlgmr.msra.gmra.mxu0 %vm74_vm0, %v41_v32  ;;  %v185_v32 = vld [vmem:[%s407_s7] sm:$0xff] }
 0x110   :  { %v95_v33 = vpop.f32.mrf.mxu0 }
 0x111   :  { %100 = vadd.xlane.f32.xlu2 %v95_v33  ;;  %v103_v34 = vmul.f32 %v95_v33, %v95_v33 }
 0x113   :  { %104 = vadd.xlane.f32.xlu0 %v103_v34 }
 0x184   :  { %v101_v36 = vpop.xlane.xlu2 %100 }
 0x185   :  { %v102_v37 = vmul.f32 0.0078125, %v101_v36 }
 0x186   :  { %v105_v38 = vpop.xlane.xlu0 %104 }
 0x187   :  { %v107_v39 = vmul.f32 %v102_v37, %v102_v37  ;;  %v106_v40 = vmul.f32 0.0078125, %v105_v38 }
 0x189   :  { %v108_v41 = vsub.f32 %v106_v40, %v107_v39 }
 0x18b   :  { %v109_v42 = vadd.f32 1e-05, %v108_v41 }
 0x18d   :  { %244 = vrsqrt.f32 %v109_v42  ;;  %vm116_vm2 = vweird.f32 %v109_v42 }
 0x193   :  { %v245_v43 = vpop.eup %244 }
 0x194   :  { %v111_v44 = vmul.f32 %v245_v43, %v109_v42  ;;  %vm117_vm1 = vweird.f32 %v245_v43 }
 0x195   :  { %vm118_vm3 = vmor %vm116_vm2, %vm117_vm1 }
 0x196   :  { %v112_v45 = vmul.f32 %v245_v43, %v111_v44 }
 0x198   :  { %v113_v46 = vmul.f32 0.5, %v112_v45 }
 0x19a   :  { %v114_v47 = vsub.f32 1.5, %v113_v46 }
 0x19c   :  { %v115_v49 = vmul.f32 %v245_v43, %v114_v47 }
 0x19e   :  { %v119_v50 = vsel %vm118_vm3, %v245_v43, %v115_v49 }
 0x19f   :  { %v120_v51 = vmul.f32 %v119_v50, %v98_v48 }
 0x1a1   :  { %125 = vperm.xlu1 %241, %v120_v51   ;;  %v121_v52 = vmul.f32 %v120_v51, %v102_v37 }
 0x1a3   :  { %v122_v54 = vsub.f32 %v99_v53, %v121_v52 }
 0x1a9   :  { %131 = vperm.xlu1 %241, %v122_v54  }
 0x213   :  { %v126_v55 = vpop.permute.xlu1 %125 }
 0x214   :  { %v128_v56 = vmul.f32 %v126_v55, %v95_v33 }
 0x21b   :  { %v132_v57 = vpop.permute.xlu1 %131 }
 0x21c   :  { %v134_v58 = vadd.f32 %v132_v57, %v128_v56 }
 0x21e   :  { %v135_v59 = vmax.f32 %v134_v58, 0.0 }
 0x220   :  { %143 = vrot.lane.b32.xlu0 %v135_v59, %s253_s18  ;;  %149 = vrot.lane.b32.xlu2 %v135_v59, %s252_s17 }
 0x221   :  { %158 = vrot.lane.b32.xlu1 %v135_v59, %s248_s13 }
 0x229   :  { %155 = vrot.lane.b32.xlu1 %v135_v59, %s251_s16 }
 0x231   :  { %152 = vrot.lane.b32.xlu1 %v135_v59, %s249_s14 }
 0x239   :  { %146 = vrot.lane.b32.xlu1 %v135_v59, %s250_s15 }
 0x241   :  { %140 = vrot.lane.b32.xlu1 %v135_v59, %s254_s0 }
 0x249   :  { %137 = vrot.lane.b32.xlu1 %v135_v59, %s255_s19 }
 0x27a   :  { %v150_v0 = vpop.permute.xlu2 %149 }
 0x27b   :  { %v151_v3 = vmul.f32 %v150_v0, %v60_v15 }
 0x292   :  { %v144_v4 = vpop.permute.xlu0 %143 }
 0x293   :  { %v159_v60 = vpop.permute.xlu1 %158 }
 0x294   :  { %v160_v61 = vmul.f32 %v325_v7, %v159_v60  ;;  %v145_v7 = vmul.f32 %v144_v4, %v52_v22 }
 0x296   :  { %171 = vmatpush.msra.mxu1 %v160_v61 }
 0x29b   :  { %v156_v62 = vpop.permute.xlu1 %155 }
 0x29c   :  { %v157_v63 = vmul.f32 %v156_v62, %v68_v13  ;;  %v136_v13 = vld [vmem:[%s405_s5] sm:$0xff] }
 0x29e   :  { %172 = vmatpush.msra.mxu1 %v157_v63 }
 0x2a3   :  { %v153_v1 = vpop.permute.xlu1 %152 }
 0x2a4   :  { %v154_v2 = vmul.f32 %v153_v1, %v64_v14 }
 0x2a6   :  { %173 = vmatpush.msra.mxu1 %v154_v2 }
 0x2a8   :  { %174 = vmatpush.msra.mxu1 %v151_v3 }
 0x2aa   :  { %175 = vmatpush.msra.mxu1 %v135_v59 }
 0x2ab   :  { %v147_v5 = vpop.permute.xlu1 %146 }
 0x2ac   :  { %v148_v6 = vmul.f32 %v147_v5, %v56_v21 }
 0x2ae   :  { %176 = vmatpush.msra.mxu1 %v148_v6 }
 0x2b0   :  { %177 = vmatpush.msra.mxu1 %v145_v7 }
 0x2b3   :  { %v141_v8 = vpop.permute.xlu1 %140 }
 0x2b4   :  { %v142_v9 = vmul.f32 %v141_v8, %v48_v24 }
 0x2b6   :  { %178 = vmatpush.msra.mxu1 %v142_v9 }
 0x2bb   :  { %v138_v10 = vpop.permute.xlu1 %137 }
 0x2bc   :  { %v139_v12 = vmul.f32 %v138_v10, %v44_v28 }
 0x2be   :  { %179 = vmatpush.msra.mxu1 %v139_v12 }
 0x2bf   :  { %231 = vmatmul.msk.f32.vlgmr.msra.gmra.mxu1 %vm74_vm0, %v136_v13 }
 0x33c   :  { %v181_v14 = vpop.f32.mrf.mxu1 }
 0x33d   :  { %186 = vadd.xlane.f32.xlu2 %v181_v14  ;;  %v189_v15 = vmul.f32 %v181_v14, %v181_v14 }
 0x33f   :  { %190 = vadd.xlane.f32.xlu0 %v189_v15 }
 0x3b0   :  { %v187_v16 = vpop.xlane.xlu2 %186 }
 0x3b1   :  { %v188_v17 = vmul.f32 0.0078125, %v187_v16 }
 0x3b2   :  { %v191_v18 = vpop.xlane.xlu0 %190 }
 0x3b3   :  { %v193_v19 = vmul.f32 %v188_v17, %v188_v17  ;;  %v192_v20 = vmul.f32 0.0078125, %v191_v18 }
 0x3b5   :  { %v194_v21 = vsub.f32 %v192_v20, %v193_v19 }
 0x3b7   :  { %v195_v22 = vadd.f32 1e-05, %v194_v21 }
 0x3b9   :  { %246 = vrsqrt.f32 %v195_v22  ;;  %vm202_vm5 = vweird.f32 %v195_v22 }
 0x3bf   :  { %v247_v11 = vpop.eup %246 }
 0x3c0   :  { %v197_v23 = vmul.f32 %v247_v11, %v195_v22  ;;  %vm203_vm4 = vweird.f32 %v247_v11 }
 0x3c1   :  { %vm204_vm6 = vmor %vm202_vm5, %vm203_vm4 }
 0x3c2   :  { %v198_v24 = vmul.f32 %v247_v11, %v197_v23 }
 0x3c4   :  { %v199_v25 = vmul.f32 0.5, %v198_v24 }
 0x3c6   :  { %v200_v26 = vsub.f32 1.5, %v199_v25 }
 0x3c8   :  { %v201_v28 = vmul.f32 %v247_v11, %v200_v26 }
 0x3ca   :  { %v205_v29 = vsel %vm204_vm6, %v247_v11, %v201_v28 }
 0x3cb   :  { %v206_v30 = vmul.f32 %v205_v29, %v184_v27 }
 0x3cd   :  { %211 = vperm.xlu1 %241, %v206_v30   ;;  %v207_v31 = vmul.f32 %v206_v30, %v188_v17 }
 0x3cf   :  { %v208_v33 = vsub.f32 %v185_v32, %v207_v31 }
 0x3d5   :  { %217 = vperm.xlu1 %241, %v208_v33  }
 0x43f   :  { %v212_v34 = vpop.permute.xlu1 %211 }
 0x440   :  { %v214_v35 = vmul.f32 %v212_v34, %v181_v14 }
 0x447   :  { %v218_v36 = vpop.permute.xlu1 %217 }
 0x448   :  { %v220_v37 = vadd.f32 %v218_v36, %v214_v35 }
 0x44a   :  { %v221_v38 = vmax.f32 %v220_v37, 0.0 }
 0x44c   :  { %222 = vst [vmem:[%s408_s8] sm:$0xff] %v221_v38 }

</bundles_post_ra>
